<compile_context>
chip_gen: v6e
topology: v6e:2x2x1
jax: 0.10.0
libtpu: 0.0.40
codegen_flags: <defaults>
</compile_context>

<pallas_src>
import functools

import jax
import jax.numpy as jnp
import numpy as np
from jax import lax
from jax.experimental import pallas as pl
from jax.experimental.pallas import tpu as pltpu


# ---------------------------------------------------------------------------
# Fused one_conv kernel (Bt images per grid step)
# ---------------------------------------------------------------------------
def _one_conv_kernel(x_ref, wcat_ref, brow_ref, o_ref, xs_ref, *, Bt, H, Kin, Nc):
    # x_ref   : (Bt, H, Kin)        f32   channel-major slab, lane = c*W + w
    # wcat_ref: (3*Kin, Nc)         bf16  stacked block-Toeplitz conv weights
    # brow_ref: (1, Nc)             f32   bias per conv output lane
    # o_ref   : (Bt, H, Kin + Nc)         [ x | lrelu(conv3x3(x) + b) ]
    # xs_ref  : (Bt, H + 2, Kin)    f32   scratch: height-padded copy of x
    x = x_ref[...]                                          # (Bt, H, Kin)

    # 1) Exact pass-through of x -> first Kin output lanes (pure copy, no MXU).
    o_ref[:, :, 0:Kin] = x.astype(o_ref.dtype)

    # 2) In-kernel H halo: stage x into padded scratch, zero the halo rows.
    zrow = jnp.zeros((Bt, 1, Kin), xs_ref.dtype)
    xs_ref[:, pl.ds(0, 1), :] = zrow
    xs_ref[:, pl.ds(1, H), :] = x
    xs_ref[:, pl.ds(H + 1, 1), :] = zrow

    # 3) Single MXU matmul (K = 3*Kin): lane-concat the three dy taps, loaded
    #    as ref slices so sublane offsets 1/2 are handled by the load unit.
    taps = [xs_ref[:, pl.ds(dy, H), :].astype(jnp.bfloat16) for dy in range(3)]
    xcat = jnp.concatenate(taps, axis=-1).reshape(Bt * H, 3 * Kin)
    acc = jnp.dot(xcat, wcat_ref[...],
                  preferred_element_type=jnp.float32)       # (Bt*H, Nc)

    # 4) Bias + LeakyReLU(0.1), store into the conv half of the output lanes.
    y = acc + brow_ref[...]
    y = jnp.where(y >= 0.0, y, 0.1 * y)
    o_ref[:, :, Kin:Kin + Nc] = y.reshape(Bt, H, Nc).astype(o_ref.dtype)


# ---------------------------------------------------------------------------
# One-time weight preparation (host side): bake width-pad + Toeplitz structure
# ---------------------------------------------------------------------------
def prepare_one_conv_params(w_oihw, b, *, width):
    """w_oihw: (G, G0, 3, 3) PyTorch Conv2d weight, b: (G,)."""
    w = np.asarray(w_oihw, dtype=np.float32)
    b = np.asarray(b, dtype=np.float32)
    G, G0 = w.shape[0], w.shape[1]
    W = width
    Kin, Nc = G0 * W, G * W

    # wcat[dy*Kin + c*W + wsrc, g*W + wp] = w[g, c, dy, dx], wsrc = wp + dx - 1.
    # Width zero-padding = missing rows; channel-major lanes on both sides.
    wcat = np.zeros((3 * Kin, Nc), np.float32)
    for dy in range(3):
        for dx in range(3):
            for wp in range(W):
                wsrc = wp + dx - 1
                if not (0 <= wsrc < W):
                    continue
                for c in range(G0):
                    wcat[dy * Kin + c * W + wsrc, wp::W] = w[:, c, dy, dx]

    brow = np.repeat(b, W).reshape(1, Nc)                   # lane g*W + wp -> b[g]
    return {
        "wcat": jnp.asarray(wcat, jnp.bfloat16),            # bf16 MXU operand
        "brow": jnp.asarray(brow, jnp.float32),
        "G0": G0, "G": G, "W": W,
    }


# ---------------------------------------------------------------------------
# Forward wrappers
# ---------------------------------------------------------------------------
def _pick_batch_tile(N, batch_tile):
    # Keep >= 2 grid steps when N > 1 (v7x has 2 TensorCores), fold as many
    # images per step as allowed otherwise; Bt must divide N (no partial blocks).
    cap = max(1, min(batch_tile, (N + 1) // 2))
    for bt in range(cap, 0, -1):
        if N % bt == 0:
            return bt
    return 1


def one_conv_forward_slab(x_slab, prep, *, batch_tile=8, out_dtype=jnp.float32):
    """x_slab: (N, H, G0*W) channel-major slab (lane = c*W + w), f32.

    Returns (N, H, (G0+G)*W): lanes [0, G0*W) are x unchanged and lanes
    [G0*W, (G0+G)*W) are lrelu(conv3x3(x) + b), i.e. cat((x, y), dim=C) in the
    same channel-major layout -- one_conv layers chain with zero re-layout.
    """
    N, H, Kin = x_slab.shape
    G0, G, W = prep["G0"], prep["G"], prep["W"]
    assert Kin == G0 * W, "input slab does not match prepared params"
    Nc = G * W
    Nout = Kin + Nc
    Bt = _pick_batch_tile(N, batch_tile)

    return pl.pallas_call(
        functools.partial(_one_conv_kernel, Bt=Bt, H=H, Kin=Kin, Nc=Nc),
        out_shape=jax.ShapeDtypeStruct((N, H, Nout), out_dtype),
        grid_spec=pltpu.PrefetchScalarGridSpec(
            num_scalar_prefetch=0,
            grid=(N // Bt,),
            in_specs=[
                pl.BlockSpec((Bt, H, Kin), lambda n: (n, 0, 0)),
                pl.BlockSpec((3 * Kin, Nc), lambda n: (0, 0)),   # VMEM-resident
                pl.BlockSpec((1, Nc), lambda n: (0, 0)),
            ],
            out_specs=pl.BlockSpec((Bt, H, Nout), lambda n: (n, 0, 0)),
            scratch_shapes=[pltpu.VMEM((Bt, H + 2, Kin), jnp.float32)],
        ),
        compiler_params=pltpu.CompilerParams(
            dimension_semantics=("parallel",)),
    )(x_slab, prep["wcat"], prep["brow"])


def one_conv_forward_nchw(x_nchw, prep, **kw):
    """PyTorch-layout convenience wrapper: (N, G0, H, W) -> (N, G0+G, H, W).

    Production callers should stay in the (N, H, C*W) slab layout between
    layers (the slab output feeds the next one_conv directly); the transposes
    here are test/interop glue only.
    """
    N, G0, H, W = x_nchw.shape
    x_slab = jnp.transpose(x_nchw, (0, 2, 1, 3)).reshape(N, H, G0 * W)
    y_slab = one_conv_forward_slab(x_slab, prep, **kw)
    Ctot = G0 + prep["G"]
    return jnp.transpose(y_slab.reshape(N, H, Ctot, W), (0, 2, 1, 3))


# ---------------------------------------------------------------------------
# Self-test
# ---------------------------------------------------------------------------
if __name__ == "__main__":
    N, H, W = 2, 16, 16
    G0, G = 8, 8

    key = jax.random.PRNGKey(0)
    kx, kw, kb = jax.random.split(key, 3)
    # PyTorch-layout tensors: x NCHW, Conv2d weight OIHW, bias (G,)
    x = jax.random.normal(kx, (N, G0, H, W), jnp.float32)
    w = jax.random.normal(kw, (G, G0, 3, 3), jnp.float32) / np.sqrt(G0 * 9)
    b = jax.random.normal(kb, (G,), jnp.float32) * 0.05

    prep = prepare_one_conv_params(w, b, width=W)
    fwd = jax.jit(lambda xx: one_conv_forward_nchw(xx, prep))
    out = jax.block_until_ready(fwd(x))

    # Pure-JAX NCHW reference mirroring the PyTorch module exactly (all f32).
    y = lax.conv_general_dilated(
        x, w, window_strides=(1, 1), padding=((1, 1), (1, 1)),
        dimension_numbers=("NCHW", "OIHW", "NCHW"),
    ) + b.reshape(1, G, 1, 1)
    y = jnp.where(y >= 0.0, y, 0.1 * y)
    ref = jax.block_until_ready(jnp.concatenate([x, y], axis=1))

    assert out.shape == (N, G0 + G, H, W)
    # Pass-through channels are a pure copy now -> essentially exact.
    assert jnp.allclose(out[:, :G0], ref[:, :G0], atol=1e-6, rtol=0.0), \
        "pass-through channels mismatch"
    # Conv channels use bf16 MXU operands with f32 accumulation -> loose tol.
    assert jnp.allclose(out[:, G0:], ref[:, G0:], atol=5e-2, rtol=5e-2), \
        "conv channels mismatch"

    print("KERNEL_OK")
</pallas_src>

<mosaic_0001>
module attributes {stable_mosaic.version = 11 : i64} {
  func.func @_one_conv_kernel(%arg0: i32, %arg1: memref<1x16x128xf32, #tpu.memory_space<vmem>>, %arg2: memref<384x128xbf16, #tpu.memory_space<vmem>>, %arg3: memref<1x128xf32, #tpu.memory_space<vmem>>, %arg4: memref<1x16x256xf32, #tpu.memory_space<vmem>>, %arg5: memref<1x18x128xf32, #tpu.memory_space<vmem>>) attributes {dimension_semantics = [#tpu.dimension_semantics<parallel>], iteration_bounds = array<i64: 2>, scalar_prefetch = 0 : i64, scratch_operands = 1 : i64, tpu.core_type = #tpu.core_type<tc>, window_params = [{transform_indices = @transform_0, window_bounds = array<i64: 1, 16, 128>}, {pipeline_mode = #tpu.pipeline_mode<synchronous>, transform_indices = @transform_1, window_bounds = array<i64: 384, 128>}, {pipeline_mode = #tpu.pipeline_mode<synchronous>, transform_indices = @transform_2, window_bounds = array<i64: 1, 128>}, {transform_indices = @transform_3, window_bounds = array<i64: 1, 16, 256>}]} {
    %c0 = arith.constant 0 : index
    %c0_0 = arith.constant 0 : index
    %c0_1 = arith.constant 0 : index
    %0 = vector.load %arg1[%c0, %c0_0, %c0_1] : memref<1x16x128xf32, #tpu.memory_space<vmem>>, vector<1x16x128xf32>
    %c0_2 = arith.constant 0 : index
    %c0_3 = arith.constant 0 : index
    %c0_4 = arith.constant 0 : index
    %1 = vector.load %arg4[%c0_2, %c0_3, %c0_4] : memref<1x16x256xf32, #tpu.memory_space<vmem>>, vector<1x16x128xf32>
    tpu.vector_store %arg4[%c0_2, %c0_3, %c0_4], %0 {strides = array<i32>} : memref<1x16x256xf32, #tpu.memory_space<vmem>>, vector<1x16x128xf32>,
    %cst = arith.constant 0.000000e+00 : f32
    %2 = vector.broadcast %cst : f32 to vector<1x1x128xf32>
    %c0_5 = arith.constant 0 : index
    %c0_6 = arith.constant 0 : index
    %c0_7 = arith.constant 0 : index
    %3 = vector.load %arg5[%c0_5, %c0_6, %c0_7] : memref<1x18x128xf32, #tpu.memory_space<vmem>>, vector<1x1x128xf32>
    tpu.vector_store %arg5[%c0_5, %c0_6, %c0_7], %2 {strides = array<i32>} : memref<1x18x128xf32, #tpu.memory_space<vmem>>, vector<1x1x128xf32>,
    %c0_8 = arith.constant 0 : index
    %c1 = arith.constant 1 : index
    %c0_9 = arith.constant 0 : index
    %4 = vector.load %arg5[%c0_8, %c1, %c0_9] : memref<1x18x128xf32, #tpu.memory_space<vmem>>, vector<1x16x128xf32>
    tpu.vector_store %arg5[%c0_8, %c1, %c0_9], %0 {strides = array<i32>} : memref<1x18x128xf32, #tpu.memory_space<vmem>>, vector<1x16x128xf32>,
    %c0_10 = arith.constant 0 : index
    %c17 = arith.constant 17 : index
    %c0_11 = arith.constant 0 : index
    %5 = vector.load %arg5[%c0_10, %c17, %c0_11] : memref<1x18x128xf32, #tpu.memory_space<vmem>>, vector<1x1x128xf32>
    tpu.vector_store %arg5[%c0_10, %c17, %c0_11], %2 {strides = array<i32>} : memref<1x18x128xf32, #tpu.memory_space<vmem>>, vector<1x1x128xf32>,
    %c0_12 = arith.constant 0 : index
    %c0_13 = arith.constant 0 : index
    %c0_14 = arith.constant 0 : index
    %6 = vector.load %arg5[%c0_12, %c0_13, %c0_14] : memref<1x18x128xf32, #tpu.memory_space<vmem>>, vector<1x16x128xf32>
    %7 = arith.truncf %6 : vector<1x16x128xf32> to vector<1x16x128xbf16>
    %c0_15 = arith.constant 0 : index
    %c1_16 = arith.constant 1 : index
    %c0_17 = arith.constant 0 : index
    %8 = vector.load %arg5[%c0_15, %c1_16, %c0_17] : memref<1x18x128xf32, #tpu.memory_space<vmem>>, vector<1x16x128xf32>
    %9 = arith.truncf %8 : vector<1x16x128xf32> to vector<1x16x128xbf16>
    %c0_18 = arith.constant 0 : index
    %c2 = arith.constant 2 : index
    %c0_19 = arith.constant 0 : index
    %10 = vector.load %arg5[%c0_18, %c2, %c0_19] : memref<1x18x128xf32, #tpu.memory_space<vmem>>, vector<1x16x128xf32>
    %11 = arith.truncf %10 : vector<1x16x128xf32> to vector<1x16x128xbf16>
    %12 = tpu.concatenate %7, %9, %11 in 2 : vector<1x16x128xbf16>, vector<1x16x128xbf16>, vector<1x16x128xbf16> -> vector<1x16x384xbf16>
    %13 = vector.shape_cast %12 : vector<1x16x384xbf16> to vector<16x384xbf16>
    %c0_20 = arith.constant 0 : index
    %c0_21 = arith.constant 0 : index
    %14 = vector.load %arg2[%c0_20, %c0_21] : memref<384x128xbf16, #tpu.memory_space<vmem>>, vector<384x128xbf16>
    %cst_22 = arith.constant dense<0.000000e+00> : vector<16x128xf32>
    %15 = tpu.matmul %13, %14, %cst_22 {dimension_numbers = #tpu.dot_dimension_numbers<[1], [0], [0], [1], [0, 0, 1, 1], [], []>} : vector<16x384xbf16>, vector<384x128xbf16>, vector<16x128xf32> -> vector<16x128xf32>
    %c0_23 = arith.constant 0 : index
    %c0_24 = arith.constant 0 : index
    %16 = vector.load %arg3[%c0_23, %c0_24] : memref<1x128xf32, #tpu.memory_space<vmem>>, vector<1x128xf32>
    %17 = vector.broadcast %16 : vector<1x128xf32> to vector<16x128xf32>
    %18 = arith.addf %15, %17 : vector<16x128xf32>
    %cst_25 = arith.constant 0.000000e+00 : f32
    %19 = vector.broadcast %cst_25 : f32 to vector<16x128xf32>
    %20 = arith.cmpf oge, %18, %19 : vector<16x128xf32>
    %cst_26 = arith.constant 1.000000e-01 : f32
    %21 = vector.broadcast %cst_26 : f32 to vector<16x128xf32>
    %22 = arith.mulf %21, %18 : vector<16x128xf32>
    %23 = arith.select %20, %18, %22 : vector<16x128xi1>, vector<16x128xf32>
    %24 = vector.shape_cast %23 : vector<16x128xf32> to vector<1x16x128xf32>
    %c0_27 = arith.constant 0 : index
    %c0_28 = arith.constant 0 : index
    %c128 = arith.constant 128 : index
    %25 = vector.load %arg4[%c0_27, %c0_28, %c128] : memref<1x16x256xf32, #tpu.memory_space<vmem>>, vector<1x16x128xf32>
    tpu.vector_store %arg4[%c0_27, %c0_28, %c128], %24 {strides = array<i32>} : memref<1x16x256xf32, #tpu.memory_space<vmem>>, vector<1x16x128xf32>,
    return
  }
  func.func @transform_0(%arg0: i32) -> (i32, i32, i32) {
    %c0_i32 = arith.constant 0 : i32
    %c0_i32_0 = arith.constant 0 : i32
    %c0_i32_1 = arith.constant 0 : i32
    return %arg0, %c0_i32, %c0_i32_0 : i32, i32, i32
  }
  func.func @transform_1(%arg0: i32) -> (i32, i32) {
    %c0_i32 = arith.constant 0 : i32
    %c0_i32_0 = arith.constant 0 : i32
    %c0_i32_1 = arith.constant 0 : i32
    return %c0_i32, %c0_i32_0 : i32, i32
  }
  func.func @transform_2(%arg0: i32) -> (i32, i32) {
    %c0_i32 = arith.constant 0 : i32
    %c0_i32_0 = arith.constant 0 : i32
    %c0_i32_1 = arith.constant 0 : i32
    return %c0_i32, %c0_i32_0 : i32, i32
  }
  func.func @transform_3(%arg0: i32) -> (i32, i32, i32) {
    %c0_i32 = arith.constant 0 : i32
    %c0_i32_0 = arith.constant 0 : i32
    %c0_i32_1 = arith.constant 0 : i32
    return %arg0, %c0_i32, %c0_i32_0 : i32, i32, i32
  }
}

</mosaic_0001>

<bundles_post_ra>
// kernel: _lambda_.1
= control target key start
LH: loop header
LB: loop body
LE: loop exit
PB: predicated region body
PF: predicated region fallthrough
CT: control target
= control target key end

     0   :  { %s686_s12 = smov 0   ;;  %s797_s0 = inlined_call_operand.vmem [shape: f32[2,16,128], index: 0, kind: input, shape index: {}]   ;;  %s798_s1 = inlined_call_operand.vmem [shape: bf16[384,128], index: 1, kind: input, shape index: {}]   ;;  %s799_s2 = inlined_call_operand.vmem [shape: f32[1,128], index: 2, kind: input, shape index: {}]   ;;  %s800_s3 = inlined_call_operand.vmem [shape: f32[2,16,256], index: 3, kind: output, shape index: {}]  }
   0x1 LB: > { %s533_s13 = sadd.s32 4294967295, %s662_s12   ;;  %p537_p0 = scmp.ge.s32.totalorder %s662_s12, 1  ;;  %s662_s12 = sphi %s686_s12, %s13_s12  }
   0x2   : > { %p137_p1 = scmp.lt.s32.totalorder %s662_s12, 3 }
   0x4   : > { %p138_p2 = pnand %p537_p0, %p137_p1 }
   0x5   : > { %p161_p3 = scmp.lt.s32.totalorder (!%p138_p2), %s533_s13, 1 }
   0x6   : > { %141 = sbr.rel (%p138_p2) target bundleno = 253 (0xfd), region = 32 }
   0xb   : > { %v632_v0 = vld [vmem:[%s798_s1 + $0x78] sm:$0xff]   ;;  %v664_v1 = vmov 0.0   ;;  %v635_v4 = vld [vmem:[%s798_s1 + $0x70] sm:$0xff]   ;;  %vm665_vm0 = vmmov 0   ;;  %v638_v7 = vld [vmem:[%s798_s1 + $0x68] sm:$0xff]   ;;  %s802_s13 = smov (!%p161_p3, %s533_s13), 1 }
   0xc   : > { %602 = vmatprep.subr.bf16.mxu1 %v664_v1  ;;  %176 = vst [vmem:[#allocation2] sm:$0x1] %v664_v1  ;;  %179 = vst [vmem:[#allocation2 + $0x11] sm:$0x1] %v664_v1  ;;  %v633_v2 = vld [vmem:[%s798_s1 + $0x38] sm:$0xff]   ;;  %571 = vmatprep.subr.bf16.mxu0 %v632_v0  ;;  %v636_v5 = vld [vmem:[%s798_s1 + $0x30] sm:$0xff]  }
   0xd   : > { %v634_v3 = vld [vmem:[%s798_s1 + $0xb8] sm:$0xff]   ;;  %572 = vmatpush3.bf16.msra.mxu0 %v633_v2  ;;  %618 = vmatprep.mubr.msk.bf16.mxu1 %vm665_vm0, %v664_v1  ;;  %v637_v6 = vld [vmem:[%s798_s1 + $0xb0] sm:$0xff]   ;;  %v639_v8 = vld [vmem:[%s798_s1 + $0x28] sm:$0xff]   ;;  %s569_s23 = sshll.u32 %s802_s13, 4  ;;  %s570_s16 = sshll.u32 %s802_s13, 5 }
   0xe   : > { %603 = vmatpush3.bf16.msra.mxu1 %v634_v3  ;;  %573 = vmatprep.subr.bf16.mxu0 %v635_v4  ;;  %v640_v9 = vld [vmem:[%s798_s1 + $0xa8] sm:$0xff]   ;;  %v641_v10 = vld [vmem:[%s798_s1 + $0x60] sm:$0xff]   ;;  %v644_v13 = vld [vmem:[%s798_s1 + $0x58] sm:$0xff]   ;;  %s165_s30 = scalar_lea.vmem %s797_s0, %s569_s23  ;;  %s170_s19 = scalar_lea.vmem %s800_s3, %s570_s16 }
   0xf   : > { %604 = vmatprep.subr.bf16.mxu1 %v664_v1  ;;  %v642_v11 = vld [vmem:[%s798_s1 + $0x20] sm:$0xff]   ;;  %v645_v14 = vld [vmem:[%s798_s1 + $0x18] sm:$0xff]   ;;  %v647_v16 = vld [vmem:[%s798_s1 + $0x50] sm:$0xff]  }
  0x10   : > { %v643_v12 = vld [vmem:[%s798_s1 + $0xa0] sm:$0xff]   ;;  %v646_v15 = vld [vmem:[%s798_s1 + $0x98] sm:$0xff]   ;;  %v648_v17 = vld [vmem:[%s798_s1 + $0x10] sm:$0xff]  }
  0x11   : > { %574 = vmatpush3.bf16.msra.mxu0 %v636_v5  ;;  %v649_v18 = vld [vmem:[%s798_s1 + $0x90] sm:$0xff]   ;;  %v650_v19 = vld [vmem:[%s798_s1 + $0x48] sm:$0xff]   ;;  %v653_v22 = vld [vmem:[%s798_s1 + $0x40] sm:$0xff]  }
  0x12   : > { %605 = vmatpush3.bf16.msra.mxu1 %v637_v6  ;;  %575 = vmatprep.subr.bf16.mxu0 %v638_v7  ;;  %v651_v20 = vld [vmem:[%s798_s1 + $0x8] sm:$0xff]   ;;  %v172_v23 = vld [vmem:[%s165_s30] sm:$0xff] }
  0x13   : > { %606 = vmatprep.subr.bf16.mxu1 %v664_v1  ;;  %v652_v21 = vld [vmem:[%s798_s1 + $0x88] sm:$0xff]   ;;  %177 = vst [vmem:[#allocation2 + $0x1] sm:$0xff] %v172_v23  ;;  %v654_v26 = vld [vmem:[%s798_s1] sm:$0xff]   ;;  %174 = vst [vmem:[%s170_s19] sm:$0xff] %v172_v23 }
  0x14   : > { %v173_v24 = vld [vmem:[%s165_s30 + $0x8] sm:$0xff]  ;;  %v655_v27 = vld [vmem:[%s798_s1 + $0x80] sm:$0xff]  }
  0x15   : > { %576 = vmatpush3.bf16.msra.mxu0 %v639_v8  ;;  %178 = vst [vmem:[#allocation2 + $0x9] sm:$0xff] %v173_v24  ;;  %v185_v25 = vpack.c.bf16 %v173_v24, %v172_v23  ;;  %175 = vst [vmem:[%s170_s19 + $0x10] sm:$0xff] %v173_v24  ;;  %v542_v36 = vld [vmem:[%s799_s2] ss:$0 sm:$0xff] }
  0x16   : > { %607 = vmatpush3.bf16.msra.mxu1 %v640_v9  ;;  %577 = vmatprep.subr.bf16.mxu0 %v641_v10 }
  0x17   : > { %608 = vmatprep.subr.bf16.mxu1 %v664_v1  ;;  %420 = vmatprep.mubr.bf16.mxu0 %v185_v25 }
  0x19   : > { %578 = vmatpush3.bf16.msra.mxu0 %v642_v11 }
  0x1a   : > { %609 = vmatpush3.bf16.msra.mxu1 %v643_v12  ;;  %579 = vmatprep.subr.bf16.mxu0 %v644_v13  ;;  %v180_v28 = vld [vmem:[#allocation2] sm:$0xff] }
  0x1b   : > { %610 = vmatprep.subr.bf16.mxu1 %v664_v1 }
  0x1c   : > { %v181_v29 = vld [vmem:[#allocation2 + $0x8] sm:$0xff] }
  0x1d   : > { %580 = vmatpush3.bf16.msra.mxu0 %v645_v14  ;;  %v186_v30 = vld [vmem:[#allocation2 + $0x2] sm:$0xff]  ;;  %v182_v31 = vpack.c.bf16 %v181_v29, %v180_v28  ;;  %v187_v32 = vld [vmem:[#allocation2 + $0xa] sm:$0xff] }
  0x1e   : > { %611 = vmatpush3.bf16.msra.mxu1 %v646_v15  ;;  %581 = vmatprep.subr.bf16.mxu0 %v647_v16  ;;  %v188_v33 = vpack.c.bf16 %v187_v32, %v186_v30 }
  0x1f   : > { %612 = vmatprep.subr.bf16.mxu1 %v664_v1 }
  0x21   : > { %582 = vmatpush3.bf16.msra.mxu0 %v648_v17 }
  0x22   : > { %613 = vmatpush3.bf16.msra.mxu1 %v649_v18  ;;  %583 = vmatprep.subr.bf16.mxu0 %v650_v19 }
  0x23   : > { %614 = vmatprep.subr.bf16.mxu1 %v664_v1 }
  0x25   : > { %584 = vmatpush3.bf16.msra.mxu0 %v651_v20 }
  0x26   : > { %615 = vmatpush3.bf16.msra.mxu1 %v652_v21  ;;  %585 = vmatprep.subr.bf16.mxu0 %v653_v22 }
  0x27   : > { %616 = vmatprep.subr.bf16.mxu1 %v664_v1 }
  0x29   : > { %586 = vmatpush3.bf16.msra.mxu0 %v654_v26 }
  0x2a   : > { %617 = vmatpush3.bf16.msra.mxu1 %v655_v27 }
  0x2c   : > { %421 = vmatmul.mubr.bf16.vlgmr.msra.gmra.mxu0 %v182_v31 }
  0x2d   : > { %619 = vmatmul.mubr.bf16.vlgmr.msra.gmra.mxu1 %v188_v33 }
  0xec   : > { %v587_v34 = vpop.f32.mrf.mxu0 }
  0xed   : > { %v463_v35 = vpop.f32.mrf.mxu1 }
  0xee   : > { %v588_v37 = vpop.f32.mrf.mxu0 }
  0xef   : > { %v589_v38 = vadd.f32 %v588_v37, %v587_v34  ;;  %v620_v39 = vpop.f32.mrf.mxu1 }
  0xf0   : > { %v590_v40 = vpop.f32.mrf.mxu0 }
  0xf1   : > { %v423_v41 = vadd.f32 %v589_v38, %v542_v36  ;;  %v466_v42 = vpop.f32.mrf.mxu1 }
  0xf2   : > { %v591_v43 = vpop.f32.mrf.mxu0 }
  0xf3   : > { %v464_v44 = vadd.f32 %v463_v35, %v423_v41  ;;  %v592_v45 = vadd.f32 %v591_v43, %v590_v40  ;;  %v621_v46 = vpop.f32.mrf.mxu1 }
  0xf5   : > { %vm470_vm1 = vcmp.ge.f32.partialorder %v464_v44, 0.0  ;;  %v472_v47 = vmul.f32 0.1, %v464_v44  ;;  %v426_v48 = vadd.f32 %v592_v45, %v542_v36 }
  0xf7   : > { %v474_v49 = vsel %vm470_vm1, %v464_v44, %v472_v47  ;;  %v467_v50 = vadd.f32 %v466_v42, %v426_v48 }
  0xf8   : > { %476 = vst [vmem:[%s170_s19 + $0x8] sm:$0xff] %v474_v49 }
  0xf9   : > { %vm471_vm2 = vcmp.ge.f32.partialorder %v467_v50, 0.0  ;;  %v473_v51 = vmul.f32 0.1, %v467_v50 }
  0xfb   : > { %v475_v52 = vsel %vm471_vm2, %v467_v50, %v473_v51 }
  0xfc   : > { %477 = vst [vmem:[%s170_s19 + $0x18] sm:$0xff] %v475_v52 }
  0xfd PF: > { %s13_s12 = sadd.s32 1, %s662_s12  }
  0xfe   : > { %p10_p4 = scmp.ge.s32.totalorder %s13_s12, 4  }
 0x100   :  { %12 = sbr.rel (!%p10_p4) target bundleno = 1 (0x1), region = 62 }

</bundles_post_ra>
